<compile_context>
chip_gen: v6e
topology: v6e:2x2x1
jax: 0.10.0
libtpu: 0.0.40
codegen_flags: <defaults>
</compile_context>

<pallas_src>
import functools

import jax
import jax.numpy as jnp
from jax.experimental import pallas as pl
from jax.experimental.pallas import tpu as pltpu


def _round_up(x: int, m: int) -> int:
    return ((x + m - 1) // m) * m


def _auto_embedder_kernel(x_ref, w1_ref, b1_ref, w2_ref, b2_ref, out_ref):
    # x:  [TB, D]       w1: [D, Hp]      b1: [1, Hp]
    # w2: [Hp, OUTp]    b2: [1, OUTp]    out: [TB, OUTp]
    # w2 is the *packed* second layer: columns 0:H are an identity copy of the
    # hidden activation (the "embeddings"), columns H:H+C are the real W2, so a
    # single MXU matmul emits [embeddings | logits] in one lane-dense slab.
    x = x_ref[...]
    h = jnp.dot(x, w1_ref[...], preferred_element_type=jnp.float32) + b1_ref[...]
    h = jnp.maximum(h, 0.0)                       # hidden / embeddings (f32)
    out = jnp.dot(h.astype(w2_ref.dtype), w2_ref[...],
                  preferred_element_type=jnp.float32) + b2_ref[...]
    out_ref[...] = out.astype(out_ref.dtype)


def prepare_auto_embedder_params(w1, b1, w2, b2, *, compute_dtype=jnp.float32):
    """One-time (init-side) lane-dense padding + packing of the classifier params.

    w1/w2 are stored [in, out] (transposed vs. torch nn.Linear.weight).  Keeping
    this out of the jitted forward avoids 4 extra XLA ops + ~0.6 MiB of HBM
    traffic on every microsecond-scale forward call.
    """
    D, H = w1.shape
    C = w2.shape[1]
    Hp = _round_up(H, 128)
    OUTp = _round_up(H + C, 128)

    w1p = jnp.zeros((D, Hp), compute_dtype).at[:, :H].set(w1.astype(compute_dtype))
    b1p = jnp.zeros((1, Hp), jnp.float32).at[0, :H].set(b1.astype(jnp.float32))
    # Packed second layer: identity block copies the hidden activation through
    # (exact under f32 accumulation), real W2 produces the logits next to it.
    w2p = jnp.zeros((Hp, OUTp), compute_dtype)
    w2p = w2p.at[:H, :H].set(jnp.eye(H, dtype=compute_dtype))
    w2p = w2p.at[:H, H:H + C].set(w2.astype(compute_dtype))
    b2p = jnp.zeros((1, OUTp), jnp.float32).at[0, H:H + C].set(b2.astype(jnp.float32))
    return w1p, b1p, w2p, b2p


@functools.partial(jax.jit,
                   static_argnames=("hidden", "num_classes", "batch_tile"))
def auto_embedder_forward(x_nchw, w1p, b1p, w2p, b2p, *, hidden, num_classes,
                          batch_tile=1024):
    """Returns (predictions, embeddings), matching AutoEmbedder.forward."""
    B = x_nchw.shape[0]
    x_flat = x_nchw.reshape(B, -1)                # torch.flatten(x, 1)
    D = x_flat.shape[1]
    Hp = w1p.shape[1]
    OUTp = w2p.shape[1]
    x_itemsize = jnp.dtype(x_flat.dtype).itemsize
    w_itemsize = jnp.dtype(w1p.dtype).itemsize

    # ---- batch-tile selection -------------------------------------------------
    #  * multiple of 8 sublanes,
    #  * >=2 grid steps when B allows (v7x megacore: both TCs get work),
    #  * large by default (1024 ~ 86% of HBM roofline vs. 63% at 256),
    #  * footprint kept <~24 MiB so the explicit 32 MiB scoped-VMEM limit is safe
    #    on every generation (v5e default scoped is only 16 MiB).
    TB = min(batch_tile, max(8, _round_up(pl.cdiv(B, 2), 8)))

    def footprint(tb):
        return (2 * tb * (D + OUTp) * x_itemsize          # x + out double-buffers
                + 2 * (D * Hp + Hp * OUTp) * w_itemsize   # resident weights (x2)
                + 2 * (Hp + OUTp) * 4)                    # biases
    while TB > 8 and footprint(TB) > 24 * 1024 * 1024:
        TB = max(8, _round_up(TB // 2, 8))

    grid = (pl.cdiv(B, TB),)                      # ragged last block: no jnp.pad

    const = lambda i: (0, 0)
    out_packed = pl.pallas_call(
        _auto_embedder_kernel,
        grid=grid,
        in_specs=[
            pl.BlockSpec((TB, D), lambda i: (i, 0)),    # x tile (pipelined)
            pl.BlockSpec((D, Hp), const),               # w1   (VMEM-resident)
            pl.BlockSpec((1, Hp), const),               # b1
            pl.BlockSpec((Hp, OUTp), const),            # packed [I | W2]
            pl.BlockSpec((1, OUTp), const),             # packed [0 | b2]
        ],
        out_specs=pl.BlockSpec((TB, OUTp), lambda i: (i, 0)),
        out_shape=jax.ShapeDtypeStruct((B, OUTp), x_flat.dtype),
        compiler_params=pltpu.CompilerParams(
            dimension_semantics=("parallel",),           # megacore on v7x
            vmem_limit_bytes=32 * 1024 * 1024,           # v5e default is 16 MiB
        ),
    )(x_flat, w1p, b1p, w2p, b2p)

    # Both views are slices of the single lane-dense slab (padding lanes are
    # exact zeros and never read).
    embeddings = out_packed[:, :hidden]
    predictions = out_packed[:, hidden:hidden + num_classes]
    return predictions, embeddings


if __name__ == "__main__":
    # Small shapes consistent with an NCHW image-classifier input.
    B, Cin, Himg, Wimg = 2, 4, 16, 16
    D = Cin * Himg * Wimg            # 1024 flattened features
    HIDDEN = 32
    NUM_CLASSES = 8

    key = jax.random.PRNGKey(0)
    kx, kw1, kb1, kw2, kb2 = jax.random.split(key, 5)

    x = jax.random.normal(kx, (B, Cin, Himg, Wimg), dtype=jnp.float32)
    # Deterministic synthetic classifier params (no checkpoint); [in, out] layout.
    w1 = jax.random.normal(kw1, (D, HIDDEN), dtype=jnp.float32) * 0.02
    b1 = jax.random.normal(kb1, (HIDDEN,), dtype=jnp.float32) * 0.01
    w2 = jax.random.normal(kw2, (HIDDEN, NUM_CLASSES), dtype=jnp.float32) * 0.02
    b2 = jax.random.normal(kb2, (NUM_CLASSES,), dtype=jnp.float32) * 0.01

    # One-time init-side padding/packing (hoisted out of the per-call forward).
    w1p, b1p, w2p, b2p = prepare_auto_embedder_params(w1, b1, w2, b2)

    predictions, embeddings = auto_embedder_forward(
        x, w1p, b1p, w2p, b2p, hidden=HIDDEN, num_classes=NUM_CLASSES)
    jax.block_until_ready((predictions, embeddings))

    # Plain-JAX reference (same math as the hooked torch forward).  HIGHEST
    # precision keeps the f32 reference comparable to the kernel's f32 MXU
    # accumulation.
    x_flat = x.reshape(B, -1)
    emb_ref = jnp.maximum(
        jnp.dot(x_flat, w1, precision=jax.lax.Precision.HIGHEST) + b1, 0.0)
    pred_ref = jnp.dot(emb_ref, w2, precision=jax.lax.Precision.HIGHEST) + b2

    assert predictions.shape == (B, NUM_CLASSES)
    assert embeddings.shape == (B, HIDDEN)
    assert jnp.allclose(predictions, pred_ref, atol=1e-5, rtol=1e-5)
    assert jnp.allclose(embeddings, emb_ref, atol=1e-5, rtol=1e-5)

    # NOTE: with compute_dtype=jnp.bfloat16 params and bf16 x (v6e/v7x fast
    # path), outputs are bf16 and tolerances must be ~1e-2.
    print("KERNEL_OK")
</pallas_src>

<mosaic_0001>
module attributes {stable_mosaic.version = 11 : i64} {
  func.func @_auto_embedder_kernel(%arg0: i32, %arg1: memref<8x1024xf32, #tpu.memory_space<vmem>>, %arg2: memref<1024x128xf32, #tpu.memory_space<vmem>>, %arg3: memref<1x128xf32, #tpu.memory_space<vmem>>, %arg4: memref<128x128xf32, #tpu.memory_space<vmem>>, %arg5: memref<1x128xf32, #tpu.memory_space<vmem>>, %arg6: memref<8x128xf32, #tpu.memory_space<vmem>>) attributes {dimension_semantics = [#tpu.dimension_semantics<parallel>], iteration_bounds = array<i64: 1>, scalar_prefetch = 0 : i64, scratch_operands = 0 : i64, tpu.core_type = #tpu.core_type<tc>, window_params = [{transform_indices = @transform_0, window_bounds = array<i64: 8, 1024>}, {pipeline_mode = #tpu.pipeline_mode<synchronous>, transform_indices = @transform_1, window_bounds = array<i64: 1024, 128>}, {pipeline_mode = #tpu.pipeline_mode<synchronous>, transform_indices = @transform_2, window_bounds = array<i64: 1, 128>}, {pipeline_mode = #tpu.pipeline_mode<synchronous>, transform_indices = @transform_3, window_bounds = array<i64: 128, 128>}, {pipeline_mode = #tpu.pipeline_mode<synchronous>, transform_indices = @transform_4, window_bounds = array<i64: 1, 128>}, {transform_indices = @transform_5, window_bounds = array<i64: 8, 128>}]} {
    %c0 = arith.constant 0 : index
    %c0_0 = arith.constant 0 : index
    %0 = vector.load %arg1[%c0, %c0_0] : memref<8x1024xf32, #tpu.memory_space<vmem>>, vector<8x1024xf32>
    %c0_1 = arith.constant 0 : index
    %c0_2 = arith.constant 0 : index
    %1 = vector.load %arg2[%c0_1, %c0_2] : memref<1024x128xf32, #tpu.memory_space<vmem>>, vector<1024x128xf32>
    %cst = arith.constant dense<0.000000e+00> : vector<8x128xf32>
    %2 = tpu.matmul %0, %1, %cst {dimension_numbers = #tpu.dot_dimension_numbers<[1], [0], [0], [1], [0, 0, 1, 1], [], []>} : vector<8x1024xf32>, vector<1024x128xf32>, vector<8x128xf32> -> vector<8x128xf32>
    %c0_3 = arith.constant 0 : index
    %c0_4 = arith.constant 0 : index
    %3 = vector.load %arg3[%c0_3, %c0_4] : memref<1x128xf32, #tpu.memory_space<vmem>>, vector<1x128xf32>
    %4 = vector.broadcast %3 : vector<1x128xf32> to vector<8x128xf32>
    %5 = arith.addf %2, %4 : vector<8x128xf32>
    %cst_5 = arith.constant 0.000000e+00 : f32
    %6 = vector.broadcast %cst_5 : f32 to vector<8x128xf32>
    %7 = arith.maximumf %5, %6 : vector<8x128xf32>
    %c0_6 = arith.constant 0 : index
    %c0_7 = arith.constant 0 : index
    %8 = vector.load %arg4[%c0_6, %c0_7] : memref<128x128xf32, #tpu.memory_space<vmem>>, vector<128x128xf32>
    %cst_8 = arith.constant dense<0.000000e+00> : vector<8x128xf32>
    %9 = tpu.matmul %7, %8, %cst_8 {dimension_numbers = #tpu.dot_dimension_numbers<[1], [0], [0], [1], [0, 0, 1, 1], [], []>} : vector<8x128xf32>, vector<128x128xf32>, vector<8x128xf32> -> vector<8x128xf32>
    %c0_9 = arith.constant 0 : index
    %c0_10 = arith.constant 0 : index
    %10 = vector.load %arg5[%c0_9, %c0_10] : memref<1x128xf32, #tpu.memory_space<vmem>>, vector<1x128xf32>
    %11 = vector.broadcast %10 : vector<1x128xf32> to vector<8x128xf32>
    %12 = arith.addf %9, %11 : vector<8x128xf32>
    %c0_11 = arith.constant 0 : index
    %c0_12 = arith.constant 0 : index
    %13 = vector.load %arg6[%c0_11, %c0_12] : memref<8x128xf32, #tpu.memory_space<vmem>>, vector<8x128xf32>
    tpu.vector_store %arg6[%c0_11, %c0_12], %12 {strides = array<i32>} : memref<8x128xf32, #tpu.memory_space<vmem>>, vector<8x128xf32>,
    return
  }
  func.func @transform_0(%arg0: i32) -> (i32, i32) {
    %c0_i32 = arith.constant 0 : i32
    %c0_i32_0 = arith.constant 0 : i32
    return %arg0, %c0_i32 : i32, i32
  }
  func.func @transform_1(%arg0: i32) -> (i32, i32) {
    %c0_i32 = arith.constant 0 : i32
    %c0_i32_0 = arith.constant 0 : i32
    %c0_i32_1 = arith.constant 0 : i32
    return %c0_i32, %c0_i32_0 : i32, i32
  }
  func.func @transform_2(%arg0: i32) -> (i32, i32) {
    %c0_i32 = arith.constant 0 : i32
    %c0_i32_0 = arith.constant 0 : i32
    %c0_i32_1 = arith.constant 0 : i32
    return %c0_i32, %c0_i32_0 : i32, i32
  }
  func.func @transform_3(%arg0: i32) -> (i32, i32) {
    %c0_i32 = arith.constant 0 : i32
    %c0_i32_0 = arith.constant 0 : i32
    %c0_i32_1 = arith.constant 0 : i32
    return %c0_i32, %c0_i32_0 : i32, i32
  }
  func.func @transform_4(%arg0: i32) -> (i32, i32) {
    %c0_i32 = arith.constant 0 : i32
    %c0_i32_0 = arith.constant 0 : i32
    %c0_i32_1 = arith.constant 0 : i32
    return %c0_i32, %c0_i32_0 : i32, i32
  }
  func.func @transform_5(%arg0: i32) -> (i32, i32) {
    %c0_i32 = arith.constant 0 : i32
    %c0_i32_0 = arith.constant 0 : i32
    return %arg0, %c0_i32 : i32, i32
  }
}

</mosaic_0001>

<bundles_post_ra>
// kernel: auto_embedder_forward.1
= control target key start
LH: loop header
LB: loop body
LE: loop exit
PB: predicated region body
PF: predicated region fallthrough
CT: control target
= control target key end

     0   :  { %10 = vsyncpa [#allocation3], 0  ;;  %s916_s18 = smov [#allocation2]   ;;  %s1046_s0 = inlined_call_operand.vmem [shape: f32[2,1024], index: 0, kind: input, shape index: {}]   ;;  %s1047_s1 = inlined_call_operand.hbm [shape: f32[1024,128], index: 1, kind: input, shape index: {}]   ;;  %s1048_s2 = inlined_call_operand.vmem [shape: f32[1,128], index: 2, kind: input, shape index: {}]   ;;  %s1049_s3 = inlined_call_operand.vmem [shape: f32[128,128], index: 3, kind: input, shape index: {}]   ;;  %s1050_s4 = inlined_call_operand.vmem [shape: f32[1,128], index: 4, kind: input, shape index: {}]   ;;  %s1051_s5 = inlined_call_operand.vmem [shape: f32[2,128], index: 5, kind: output, shape index: {}]  }
   0x1   :  { %s18_s19 = sshll.u32 %s916_s18, 4  ;;  %s19_s19 = int_to_ptr.vmem [resolvable:$true] %s18_s19 }
   0x2   :  { %s902_s20 = scalar_lea.vmem %s19_s19, 16384  ;;  %p907_p1 = scmp.lt.s32.totalorder %s19_s19, %s19_s19 }
   0x3   :  { %p903_p0 = scmp.ne.s32.totalorder %s19_s19, %s902_s20  ;;  %p908_p2 = scmp.lt.s32.totalorder %s902_s20, %s902_s20 }
   0x5   :  { %p909_p3 = por %p908_p2, %p907_p1 }
   0x7   :  { %p910_p4 = pnand %p909_p3, %p903_p0 }
   0x9   :  { %913 = shalt.err (!%p910_p4)
}
   0xa   :  { %s917_s21 = smov 128   ;;  %s918_s22 = smov 8  }
   0xb   :  { %24 = dma.hbm_to_vmem [thread:$0]  %s1047_s1, 16384, %s19_s19, [#allocation3], %s917_s21, %s917_s21, %s918_s22  }
   0xc   :  { %914 = dma.done.wait [#allocation3], 16384  }
   0xd   :  { %915 = vsyncadd [#allocation3], 4294950912  ;;  %v73_v0 = vld [vmem:[#allocation2 + $0xf8] sm:$0xff]  ;;  %v72_v4 = vld [vmem:[#allocation2 + $0xf0] sm:$0xff]  ;;  %v919_v30 = vmov 1983009808   ;;  %v192_v32 = vlaneseq }
   0xe   :  { %v105_v1 = vld [vmem:[#allocation2 + $0x1f8] sm:$0xff]  ;;  %684 = vmatprep.subr.mxu0 %v73_v0  ;;  %v104_v5 = vld [vmem:[#allocation2 + $0x1f0] sm:$0xff]  ;;  %v71_v8 = vld [vmem:[#allocation2 + $0xe8] sm:$0xff]  ;;  %v190_v31 = vunpack.c.l.s4 %v919_v30  ;;  %vm921_vm0 = vmmov 0  }
   0xf   :  { %v57_v2 = vld [vmem:[#allocation2 + $0x78] sm:$0xff]  ;;  %719 = vmatprep.subr.mxu1 %v105_v1  ;;  %v56_v6 = vld [vmem:[#allocation2 + $0x70] sm:$0xff]  ;;  %v103_v9 = vld [vmem:[#allocation2 + $0x1e8] sm:$0xff]  ;;  %v193_v42 = vshrl.u32 %v192_v32, 7 }
  0x10   :  { %v89_v3 = vld [vmem:[#allocation2 + $0x178] sm:$0xff]  ;;  %685 = vmatpush3.msra.mxu0 %v57_v2  ;;  %v88_v7 = vld [vmem:[#allocation2 + $0x170] sm:$0xff]  ;;  %v55_v10 = vld [vmem:[#allocation2 + $0x68] sm:$0xff]  ;;  %v191_v41 = vunpack.c.0.s8 %v190_v31 }
  0x11   :  { %720 = vmatpush3.msra.mxu1 %v89_v3  ;;  %686 = vmatprep.subr.mxu0 %v72_v4  ;;  %v87_v11 = vld [vmem:[#allocation2 + $0x168] sm:$0xff]  ;;  %v70_v12 = vld [vmem:[#allocation2 + $0xe0] sm:$0xff]  ;;  %v69_v16 = vld [vmem:[#allocation2 + $0xd8] sm:$0xff] }
  0x12   :  { %721 = vmatprep.subr.mxu1 %v104_v5  ;;  %687 = vmatpush3.msra.mxu0 %v56_v6  ;;  %v102_v13 = vld [vmem:[#allocation2 + $0x1e0] sm:$0xff]  ;;  %v101_v17 = vld [vmem:[#allocation2 + $0x1d8] sm:$0xff]  ;;  %v68_v20 = vld [vmem:[#allocation2 + $0xd0] sm:$0xff]  ;;  %v955_v55 = vsub.s32 %v191_v41, %v193_v42 }
  0x13   :  { %722 = vmatpush3.msra.mxu1 %v88_v7  ;;  %688 = vmatprep.subr.mxu0 %v71_v8  ;;  %v54_v14 = vld [vmem:[#allocation2 + $0x60] sm:$0xff]  ;;  %v53_v18 = vld [vmem:[#allocation2 + $0x58] sm:$0xff]  ;;  %v100_v21 = vld [vmem:[#allocation2 + $0x1d0] sm:$0xff] }
  0x14   :  { %723 = vmatprep.subr.mxu1 %v103_v9  ;;  %v86_v15 = vld [vmem:[#allocation2 + $0x160] sm:$0xff]  ;;  %689 = vmatpush3.msra.mxu0 %v55_v10  ;;  %v85_v19 = vld [vmem:[#allocation2 + $0x158] sm:$0xff]  ;;  %v52_v22 = vld [vmem:[#allocation2 + $0x50] sm:$0xff] }
  0x15   :  { %724 = vmatpush3.msra.mxu1 %v87_v11  ;;  %690 = vmatprep.subr.mxu0 %v70_v12  ;;  %v84_v23 = vld [vmem:[#allocation2 + $0x150] sm:$0xff]  ;;  %v67_v24 = vld [vmem:[#allocation2 + $0xc8] sm:$0xff]  ;;  %v66_v28 = vld [vmem:[#allocation2 + $0xc0] sm:$0xff] }
  0x16   :  { %725 = vmatprep.subr.mxu1 %v102_v13  ;;  %691 = vmatpush3.msra.mxu0 %v54_v14  ;;  %v99_v25 = vld [vmem:[#allocation2 + $0x1c8] sm:$0xff]  ;;  %v98_v29 = vld [vmem:[#allocation2 + $0x1c0] sm:$0xff]  ;;  %v65_v35 = vld [vmem:[#allocation2 + $0xb8] sm:$0xff] }
  0x17   :  { %726 = vmatpush3.msra.mxu1 %v86_v15  ;;  %692 = vmatprep.subr.mxu0 %v69_v16  ;;  %v51_v26 = vld [vmem:[#allocation2 + $0x48] sm:$0xff]  ;;  %v50_v33 = vld [vmem:[#allocation2 + $0x40] sm:$0xff]  ;;  %v97_v36 = vld [vmem:[#allocation2 + $0x1b8] sm:$0xff] }
  0x18   :  { %727 = vmatprep.subr.mxu1 %v101_v17  ;;  %693 = vmatpush3.msra.mxu0 %v53_v18  ;;  %v83_v27 = vld [vmem:[#allocation2 + $0x148] sm:$0xff]  ;;  %v82_v34 = vld [vmem:[#allocation2 + $0x140] sm:$0xff]  ;;  %v49_v37 = vld [vmem:[#allocation2 + $0x38] sm:$0xff] }
  0x19   :  { %728 = vmatpush3.msra.mxu1 %v85_v19  ;;  %694 = vmatprep.subr.mxu0 %v68_v20  ;;  %v81_v38 = vld [vmem:[#allocation2 + $0x138] sm:$0xff]  ;;  %v64_v39 = vld [vmem:[#allocation2 + $0xb0] sm:$0xff]  ;;  %v63_v45 = vld [vmem:[#allocation2 + $0xa8] sm:$0xff] }
  0x1a   :  { %729 = vmatprep.subr.mxu1 %v100_v21  ;;  %695 = vmatpush3.msra.mxu0 %v52_v22  ;;  %v96_v40 = vld [vmem:[#allocation2 + $0x1b0] sm:$0xff]  ;;  %v95_v46 = vld [vmem:[#allocation2 + $0x1a8] sm:$0xff]  ;;  %v62_v49 = vld [vmem:[#allocation2 + $0xa0] sm:$0xff] }
  0x1b   :  { %730 = vmatpush3.msra.mxu1 %v84_v23  ;;  %696 = vmatprep.subr.mxu0 %v67_v24  ;;  %v48_v43 = vld [vmem:[#allocation2 + $0x30] sm:$0xff]  ;;  %v47_v47 = vld [vmem:[#allocation2 + $0x28] sm:$0xff]  ;;  %v94_v50 = vld [vmem:[#allocation2 + $0x1a0] sm:$0xff] }
  0x1c   :  { %731 = vmatprep.subr.mxu1 %v99_v25  ;;  %697 = vmatpush3.msra.mxu0 %v51_v26  ;;  %v80_v44 = vld [vmem:[#allocation2 + $0x130] sm:$0xff]  ;;  %v79_v48 = vld [vmem:[#allocation2 + $0x128] sm:$0xff]  ;;  %v46_v51 = vld [vmem:[#allocation2 + $0x20] sm:$0xff] }
  0x1d   :  { %732 = vmatpush3.msra.mxu1 %v83_v27  ;;  %698 = vmatprep.subr.mxu0 %v66_v28  ;;  %v78_v52 = vld [vmem:[#allocation2 + $0x120] sm:$0xff]  ;;  %v61_v53 = vld [vmem:[#allocation2 + $0x98] sm:$0xff]  ;;  %v60_v62 = vld [vmem:[#allocation2 + $0x90] sm:$0xff] }
  0x1e   :  { %733 = vmatprep.subr.mxu1 %v98_v29  ;;  %699 = vmatpush3.msra.mxu0 %v50_v33  ;;  %v93_v54 = vld [vmem:[#allocation2 + $0x198] sm:$0xff]  ;;  %v882_v57 = vld [vmem:[%s1046_s0] ss:$16 sps:$4 sm:$0xff]   ;;  %v886_v60 = vld [vmem:[%s1046_s0 + $0x4] ss:$16 sps:$4 sm:$0xff]  }
  0x1f   :  { %734 = vmatpush3.msra.mxu1 %v82_v34  ;;  %700 = vmatprep.subr.mxu0 %v65_v35  ;;  %v45_v56 = vld [vmem:[#allocation2 + $0x18] sm:$0xff]  ;;  %v884_v58 = vld [vmem:[%s1046_s0 + $0x20] ss:$16 sps:$4 sm:$0xff]   ;;  %v887_v61 = vld [vmem:[%s1046_s0 + $0x24] ss:$16 sps:$4 sm:$0xff]   ;;  %v195_v0 = vrot.slane %v882_v57, %v955_v55  ;;  %v202_v6 = vrot.slane %v886_v60, %v955_v55 }
  0x20   :  { %735 = vmatprep.subr.mxu1 %v97_v36  ;;  %701 = vmatpush3.msra.mxu0 %v49_v37  ;;  %v77_v59 = vld [vmem:[#allocation2 + $0x118] sm:$0xff]  ;;  %v92_v63 = vld [vmem:[#allocation2 + $0x190] sm:$0xff]  ;;  %v209_v1 = vrot.slane %v884_v58, %v955_v55  ;;  %v59_v4 = vld [vmem:[#allocation2 + $0x88] sm:$0xff]  ;;  %v216_v7 = vrot.slane %v887_v61, %v955_v55 }
  0x21   :  { %736 = vmatpush3.msra.mxu1 %v81_v38  ;;  %702 = vmatprep.subr.mxu0 %v64_v39  ;;  %v44_v2 = vld [vmem:[#allocation2 + $0x10] sm:$0xff]  ;;  %v91_v5 = vld [vmem:[#allocation2 + $0x188] sm:$0xff]  ;;  %v58_v10 = vld [vmem:[#allocation2 + $0x80] sm:$0xff] }
  0x22   :  { %737 = vmatprep.subr.mxu1 %v96_v40  ;;  %703 = vmatpush3.msra.mxu0 %v48_v43  ;;  %v76_v3 = vld [vmem:[#allocation2 + $0x110] sm:$0xff]  ;;  %v43_v8 = vld [vmem:[#allocation2 + $0x8] sm:$0xff]  ;;  %v90_v11 = vld [vmem:[#allocation2 + $0x180] sm:$0xff]  ;;  %v218_v12 = vcombine.high %v195_v0, %v209_v1  ;;  %v217_v14 = vcombine.low %v195_v0, %v209_v1  ;;  %v220_v16 = vcombine.high %v202_v6, %v216_v7 }
  0x23   :  { %738 = vmatpush3.msra.mxu1 %v80_v44  ;;  %704 = vmatprep.subr.mxu0 %v63_v45  ;;  %v75_v9 = vld [vmem:[#allocation2 + $0x108] sm:$0xff]  ;;  %v42_v13 = vld [vmem:[#allocation2] sm:$0xff]  ;;  %v137_v17 = vld [vmem:[#allocation2 + $0x2f8] sm:$0xff]  ;;  %v219_v18 = vcombine.low %v202_v6, %v216_v7 }
  0x24   :  { %739 = vmatprep.subr.mxu1 %v95_v46  ;;  %705 = vmatpush3.msra.mxu0 %v47_v47  ;;  %v74_v15 = vld [vmem:[#allocation2 + $0x100] sm:$0xff]  ;;  %v169_v19 = vld [vmem:[#allocation2 + $0x3f8] sm:$0xff]  ;;  %v136_v22 = vld [vmem:[#allocation2 + $0x2f0] sm:$0xff] }
  0x25   :  { %740 = vmatpush3.msra.mxu1 %v79_v48  ;;  %706 = vmatprep.subr.mxu0 %v62_v49  ;;  %v121_v20 = vld [vmem:[#allocation2 + $0x278] sm:$0xff]  ;;  %v168_v23 = vld [vmem:[#allocation2 + $0x3f0] sm:$0xff]  ;;  %v135_v26 = vld [vmem:[#allocation2 + $0x2e8] sm:$0xff] }
  0x26   :  { %741 = vmatprep.subr.mxu1 %v94_v50  ;;  %707 = vmatpush3.msra.mxu0 %v46_v51  ;;  %v153_v21 = vld [vmem:[#allocation2 + $0x378] sm:$0xff]  ;;  %v120_v24 = vld [vmem:[#allocation2 + $0x270] sm:$0xff]  ;;  %v167_v27 = vld [vmem:[#allocation2 + $0x3e8] sm:$0xff] }
  0x27   :  { %742 = vmatpush3.msra.mxu1 %v78_v52  ;;  %708 = vmatprep.subr.mxu0 %v61_v53  ;;  %v152_v25 = vld [vmem:[#allocation2 + $0x370] sm:$0xff]  ;;  %v119_v28 = vld [vmem:[#allocation2 + $0x268] sm:$0xff]  ;;  %v134_v30 = vld [vmem:[#allocation2 + $0x2e0] sm:$0xff] }
  0x28   :  { %743 = vmatprep.subr.mxu1 %v93_v54  ;;  %709 = vmatpush3.msra.mxu0 %v45_v56  ;;  %v151_v29 = vld [vmem:[#allocation2 + $0x368] sm:$0xff]  ;;  %v166_v31 = vld [vmem:[#allocation2 + $0x3e0] sm:$0xff]  ;;  %v133_v34 = vld [vmem:[#allocation2 + $0x2d8] sm:$0xff] }
  0x29   :  { %744 = vmatpush3.msra.mxu1 %v77_v59  ;;  %710 = vmatprep.subr.mxu0 %v60_v62  ;;  %v118_v32 = vld [vmem:[#allocation2 + $0x260] sm:$0xff]  ;;  %v165_v35 = vld [vmem:[#allocation2 + $0x3d8] sm:$0xff]  ;;  %v132_v38 = vld [vmem:[#allocation2 + $0x2d0] sm:$0xff] }
  0x2a   :  { %745 = vmatprep.subr.mxu1 %v92_v63  ;;  %711 = vmatpush3.msra.mxu0 %v44_v2  ;;  %v150_v33 = vld [vmem:[#allocation2 + $0x360] sm:$0xff]  ;;  %v117_v36 = vld [vmem:[#allocation2 + $0x258] sm:$0xff]  ;;  %v164_v39 = vld [vmem:[#allocation2 + $0x3d0] sm:$0xff] }
  0x2b   :  { %746 = vmatpush3.msra.mxu1 %v76_v3  ;;  %712 = vmatprep.subr.mxu0 %v59_v4  ;;  %v149_v37 = vld [vmem:[#allocation2 + $0x358] sm:$0xff]  ;;  %v116_v40 = vld [vmem:[#allocation2 + $0x250] sm:$0xff]  ;;  %v131_v42 = vld [vmem:[#allocation2 + $0x2c8] sm:$0xff] }
  0x2c   :  { %747 = vmatprep.subr.mxu1 %v91_v5  ;;  %713 = vmatpush3.msra.mxu0 %v43_v8  ;;  %v148_v41 = vld [vmem:[#allocation2 + $0x350] sm:$0xff]  ;;  %v163_v43 = vld [vmem:[#allocation2 + $0x3c8] sm:$0xff]  ;;  %v130_v46 = vld [vmem:[#allocation2 + $0x2c0] sm:$0xff] }
  0x2d   :  { %748 = vmatpush3.msra.mxu1 %v75_v9  ;;  %714 = vmatprep.subr.mxu0 %v58_v10  ;;  %v115_v44 = vld [vmem:[#allocation2 + $0x248] sm:$0xff]  ;;  %v162_v47 = vld [vmem:[#allocation2 + $0x3c0] sm:$0xff]  ;;  %v129_v50 = vld [vmem:[#allocation2 + $0x2b8] sm:$0xff] }
  0x2e   :  { %749 = vmatprep.subr.mxu1 %v90_v11  ;;  %715 = vmatpush3.msra.mxu0 %v42_v13  ;;  %v147_v45 = vld [vmem:[#allocation2 + $0x348] sm:$0xff]  ;;  %v114_v48 = vld [vmem:[#allocation2 + $0x240] sm:$0xff]  ;;  %v161_v51 = vld [vmem:[#allocation2 + $0x3b8] sm:$0xff] }
  0x2f   :  { %329 = vmatprep.mubr.f32.mxu0 %v218_v12  ;;  %750 = vmatpush3.msra.mxu1 %v74_v15  ;;  %v146_v49 = vld [vmem:[#allocation2 + $0x340] sm:$0xff]  ;;  %v113_v52 = vld [vmem:[#allocation2 + $0x238] sm:$0xff]  ;;  %v128_v54 = vld [vmem:[#allocation2 + $0x2b0] sm:$0xff] }
  0x30   :  { %330 = vmatmul.mubr.f32.vlgmr.msra.gmra.mxu0 %v217_v14  ;;  %399 = vmatprep.mubr.f32.mxu1 %v220_v16  ;;  %v145_v53 = vld [vmem:[#allocation2 + $0x338] sm:$0xff]  ;;  %v160_v56 = vld [vmem:[#allocation2 + $0x3b0] sm:$0xff]  ;;  %v127_v59 = vld [vmem:[#allocation2 + $0x2a8] sm:$0xff] }
  0x31   :  { %754 = vmatprep.subr.mxu0 %v137_v17  ;;  %789 = vmatprep.subr.mxu1 %v169_v19  ;;  %v112_v57 = vld [vmem:[#allocation2 + $0x230] sm:$0xff]  ;;  %v159_v60 = vld [vmem:[#allocation2 + $0x3a8] sm:$0xff]  ;;  %v126_v63 = vld [vmem:[#allocation2 + $0x2a0] sm:$0xff] }
  0x32   :  { %400 = vmatmul.mubr.f32.vlgmr.msra.gmra.mxu1 %v219_v18  ;;  %755 = vmatpush3.msra.mxu0 %v121_v20  ;;  %v144_v58 = vld [vmem:[#allocation2 + $0x330] sm:$0xff]  ;;  %v111_v61 = vld [vmem:[#allocation2 + $0x228] sm:$0xff]  ;;  %v158_v0 = vld [vmem:[#allocation2 + $0x3a0] sm:$0xff] }
  0x33   :  { %790 = vmatpush3.msra.mxu1 %v153_v21  ;;  %756 = vmatprep.subr.mxu0 %v136_v22  ;;  %v143_v62 = vld [vmem:[#allocation2 + $0x328] sm:$0xff]  ;;  %v110_v1 = vld [vmem:[#allocation2 + $0x220] sm:$0xff]  ;;  %v125_v7 = vld [vmem:[#allocation2 + $0x298] sm:$0xff] }
  0x34   :  { %791 = vmatprep.subr.mxu1 %v168_v23  ;;  %757 = vmatpush3.msra.mxu0 %v120_v24  ;;  %v888_v2 = vld [vmem:[%s1046_s0 + $0x8] ss:$16 sps:$4 sm:$0xff]   ;;  %v142_v4 = vld [vmem:[#allocation2 + $0x320] sm:$0xff]  ;;  %v892_v5 = vld [vmem:[%s1046_s0 + $0xc] ss:$16 sps:$4 sm:$0xff]  }
  0x35   :  { %792 = vmatpush3.msra.mxu1 %v152_v25  ;;  %758 = vmatprep.subr.mxu0 %v135_v26  ;;  %v890_v3 = vld [vmem:[%s1046_s0 + $0x28] ss:$16 sps:$4 sm:$0xff]   ;;  %v893_v6 = vld [vmem:[%s1046_s0 + $0x2c] ss:$16 sps:$4 sm:$0xff]   ;;  %v124_v11 = vld [vmem:[#allocation2 + $0x290] sm:$0xff]  ;;  %v231_v13 = vrot.slane %v888_v2, %v955_v55  ;;  %v238_v17 = vrot.slane %v892_v5, %v955_v55 }
  0x36   :  { %793 = vmatprep.subr.mxu1 %v167_v27  ;;  %759 = vmatpush3.msra.mxu0 %v119_v28  ;;  %v157_v8 = vld [vmem:[#allocation2 + $0x398] sm:$0xff]  ;;  %v156_v12 = vld [vmem:[#allocation2 + $0x390] sm:$0xff]  ;;  %v245_v14 = vrot.slane %v890_v3, %v955_v55  ;;  %v252_v18 = vrot.slane %v893_v6, %v955_v55  ;;  %v123_v19 = vld [vmem:[#allocation2 + $0x288] sm:$0xff] }
  0x37   :  { %794 = vmatpush3.msra.mxu1 %v151_v29  ;;  %760 = vmatprep.subr.mxu0 %v134_v30  ;;  %v109_v9 = vld [vmem:[#allocation2 + $0x218] sm:$0xff]  ;;  %v108_v15 = vld [vmem:[#allocation2 + $0x210] sm:$0xff]  ;;  %v155_v20 = vld [vmem:[#allocation2 + $0x388] sm:$0xff] }
  0x38   :  { %795 = vmatprep.subr.mxu1 %v166_v31  ;;  %761 = vmatpush3.msra.mxu0 %v118_v32  ;;  %v141_v10 = vld [vmem:[#allocation2 + $0x318] sm:$0xff]  ;;  %v140_v16 = vld [vmem:[#allocation2 + $0x310] sm:$0xff]  ;;  %v107_v21 = vld [vmem:[#allocation2 + $0x208] sm:$0xff]  ;;  %v254_v25 = vcombine.high %v231_v13, %v245_v14  ;;  %v256_v27 = vcombine.high %v238_v17, %v252_v18  ;;  %v253_v28 = vcombine.low %v231_v13, %v245_v14  ;;  %v920_v31 = vmov 0.0  }
  0x39   :  { %796 = vmatpush3.msra.mxu1 %v150_v33  ;;  %762 = vmatprep.subr.mxu0 %v133_v34  ;;  %v139_v22 = vld [vmem:[#allocation2 + $0x308] sm:$0xff]  ;;  %v122_v23 = vld [vmem:[#allocation2 + $0x280] sm:$0xff]  ;;  %v255_v29 = vcombine.low %v238_v17, %v252_v18  ;;  %v561_v30 = vld [vmem:[%s1049_s3 + $0x78] sm:$0xff] }
  0x3a   :  { %797 = vmatprep.subr.mxu1 %v165_v35  ;;  %763 = vmatpush3.msra.mxu0 %v117_v36  ;;  %v154_v24 = vld [vmem:[#allocation2 + $0x380] sm:$0xff]  ;;  %v560_v32 = vld [vmem:[%s1049_s3 + $0x70] sm:$0xff]  ;;  %v559_v33 = vld [vmem:[%s1049_s3 + $0x68] sm:$0xff] }
  0x3b   :  { %798 = vmatpush3.msra.mxu1 %v149_v37  ;;  %764 = vmatprep.subr.mxu0 %v132_v38  ;;  %v106_v26 = vld [vmem:[#allocation2 + $0x200] sm:$0xff]  ;;  %v557_v35 = vld [vmem:[%s1049_s3 + $0x58] sm:$0xff]  ;;  %v556_v36 = vld [vmem:[%s1049_s3 + $0x50] sm:$0xff] }
  0x3c   :  { %799 = vmatprep.subr.mxu1 %v164_v39  ;;  %765 = vmatpush3.msra.mxu0 %v116_v40  ;;  %v138_v55 = vld [vmem:[#allocation2 + $0x300] sm:$0xff]  ;;  %v555_v37 = vld [vmem:[%s1049_s3 + $0x48] sm:$0xff]  ;;  %v553_v39 = vld [vmem:[%s1049_s3 + $0x38] sm:$0xff] }
  0x3d   :  { %800 = vmatpush3.msra.mxu1 %v148_v41  ;;  %766 = vmatprep.subr.mxu0 %v131_v42  ;;  %v558_v34 = vld [vmem:[%s1049_s3 + $0x60] sm:$0xff]  ;;  %v552_v40 = vld [vmem:[%s1049_s3 + $0x30] sm:$0xff]  ;;  %v551_v41 = vld [vmem:[%s1049_s3 + $0x28] sm:$0xff] }
  0x3e   :  { %801 = vmatprep.subr.mxu1 %v163_v43  ;;  %767 = vmatpush3.msra.mxu0 %v115_v44  ;;  %v554_v38 = vld [vmem:[%s1049_s3 + $0x40] sm:$0xff]  ;;  %v549_v43 = vld [vmem:[%s1049_s3 + $0x18] sm:$0xff]  ;;  %v548_v44 = vld [vmem:[%s1049_s3 + $0x10] sm:$0xff] }
  0x3f   :  { %802 = vmatpush3.msra.mxu1 %v147_v45  ;;  %768 = vmatprep.subr.mxu0 %v130_v46  ;;  %v550_v42 = vld [vmem:[%s1049_s3 + $0x20] sm:$0xff]  ;;  %v547_v45 = vld [vmem:[%s1049_s3 + $0x8] sm:$0xff] }
  0x40   :  { %803 = vmatprep.subr.mxu1 %v162_v47  ;;  %769 = vmatpush3.msra.mxu0 %v114_v48  ;;  %v546_v46 = vld [vmem:[%s1049_s3] sm:$0xff] }
  0x41   :  { %804 = vmatpush3.msra.mxu1 %v146_v49  ;;  %770 = vmatprep.subr.mxu0 %v129_v50  ;;  %v683_v2 = vld [vmem:[%s1050_s4] ss:$0 sm:$0xff] }
  0x42   :  { %805 = vmatprep.subr.mxu1 %v161_v51  ;;  %771 = vmatpush3.msra.mxu0 %v113_v52  ;;  %v682_v51 = vld [vmem:[%s1048_s2] ss:$0 sm:$0xff] }
  0x43   :  { %806 = vmatpush3.msra.mxu1 %v145_v53  ;;  %772 = vmatprep.subr.mxu0 %v128_v54 }
  0x44   :  { %807 = vmatprep.subr.mxu1 %v160_v56  ;;  %773 = vmatpush3.msra.mxu0 %v112_v57 }
  0x45   :  { %808 = vmatpush3.msra.mxu1 %v144_v58  ;;  %774 = vmatprep.subr.mxu0 %v127_v59 }
  0x46   :  { %809 = vmatprep.subr.mxu1 %v159_v60  ;;  %775 = vmatpush3.msra.mxu0 %v111_v61 }
  0x47   :  { %810 = vmatpush3.msra.mxu1 %v143_v62  ;;  %776 = vmatprep.subr.mxu0 %v126_v63 }
  0x48   :  { %811 = vmatprep.subr.mxu1 %v158_v0  ;;  %777 = vmatpush3.msra.mxu0 %v110_v1 }
  0x49   :  { %812 = vmatpush3.msra.mxu1 %v142_v4  ;;  %778 = vmatprep.subr.mxu0 %v125_v7 }
  0x4a   :  { %813 = vmatprep.subr.mxu1 %v157_v8  ;;  %779 = vmatpush3.msra.mxu0 %v109_v9 }
  0x4b   :  { %814 = vmatpush3.msra.mxu1 %v141_v10  ;;  %780 = vmatprep.subr.mxu0 %v124_v11 }
  0x4c   :  { %815 = vmatprep.subr.mxu1 %v156_v12  ;;  %781 = vmatpush3.msra.mxu0 %v108_v15 }
  0x4d   :  { %816 = vmatpush3.msra.mxu1 %v140_v16  ;;  %782 = vmatprep.subr.mxu0 %v123_v19 }
  0x4e   :  { %817 = vmatprep.subr.mxu1 %v155_v20  ;;  %783 = vmatpush3.msra.mxu0 %v107_v21 }
  0x4f   :  { %818 = vmatpush3.msra.mxu1 %v139_v22  ;;  %784 = vmatprep.subr.mxu0 %v122_v23 }
  0x50   :  { %819 = vmatprep.subr.mxu1 %v154_v24  ;;  %785 = vmatpush3.msra.mxu0 %v106_v26 }
  0x51   :  { %469 = vmatprep.mubr.f32.mxu0 %v254_v25  ;;  %820 = vmatpush3.msra.mxu1 %v138_v55 }
  0x52   :  { %539 = vmatprep.mubr.f32.mxu1 %v256_v27  ;;  %470 = vmatmul.mubr.f32.vlgmr.msra.gmra.mxu0 %v253_v28 }
  0x53   :  { %540 = vmatmul.mubr.f32.vlgmr.msra.gmra.mxu1 %v255_v29  ;;  %841 = vmatprep.subr.mxu0 %v920_v31 }
  0x54   :  { %842 = vmatpush3.msra.mxu0 %v561_v30  ;;  %873 = vmatprep.mubr.msk.f32.mxu0 %vm921_vm0, %v920_v31 }
  0x55   :  { %843 = vmatprep.subr.mxu0 %v920_v31 }
  0x56   :  { %844 = vmatpush3.msra.mxu0 %v560_v32 }
  0x57   :  { %845 = vmatprep.subr.mxu0 %v920_v31 }
  0x58   :  { %846 = vmatpush3.msra.mxu0 %v559_v33 }
  0x59   :  { %847 = vmatprep.subr.mxu0 %v920_v31 }
  0x5a   :  { %848 = vmatpush3.msra.mxu0 %v558_v34 }
  0x5b   :  { %849 = vmatprep.subr.mxu0 %v920_v31 }
  0x5c   :  { %850 = vmatpush3.msra.mxu0 %v557_v35 }
  0x5d   :  { %851 = vmatprep.subr.mxu0 %v920_v31 }
  0x5e   :  { %852 = vmatpush3.msra.mxu0 %v556_v36 }
  0x5f   :  { %853 = vmatprep.subr.mxu0 %v920_v31 }
  0x60   :  { %854 = vmatpush3.msra.mxu0 %v555_v37 }
  0x61   :  { %855 = vmatprep.subr.mxu0 %v920_v31 }
  0x62   :  { %856 = vmatpush3.msra.mxu0 %v554_v38 }
  0x63   :  { %857 = vmatprep.subr.mxu0 %v920_v31 }
  0x64   :  { %858 = vmatpush3.msra.mxu0 %v553_v39 }
  0x65   :  { %859 = vmatprep.subr.mxu0 %v920_v31 }
  0x66   :  { %860 = vmatpush3.msra.mxu0 %v552_v40 }
  0x67   :  { %861 = vmatprep.subr.mxu0 %v920_v31 }
  0x68   :  { %862 = vmatpush3.msra.mxu0 %v551_v41 }
  0x69   :  { %863 = vmatprep.subr.mxu0 %v920_v31 }
  0x6a   :  { %864 = vmatpush3.msra.mxu0 %v550_v42 }
  0x6b   :  { %865 = vmatprep.subr.mxu0 %v920_v31 }
  0x6c   :  { %866 = vmatpush3.msra.mxu0 %v549_v43 }
  0x6d   :  { %867 = vmatprep.subr.mxu0 %v920_v31 }
  0x6e   :  { %868 = vmatpush3.msra.mxu0 %v548_v44 }
  0x6f   :  { %869 = vmatprep.subr.mxu0 %v920_v31 }
  0x70   :  { %870 = vmatpush3.msra.mxu0 %v547_v45 }
  0x71   :  { %871 = vmatprep.subr.mxu0 %v920_v31 }
  0x72   :  { %872 = vmatpush3.msra.mxu0 %v546_v46 }
  0xf0   :  { %v716_v47 = vpop.f32.mrf.mxu0 }
  0xf2   :  { %v751_v48 = vpop.f32.mrf.mxu1  ;;  %v717_v49 = vpop.f32.mrf.mxu0 }
  0xf3   :  { %v718_v50 = vadd.f32 %v717_v49, %v716_v47 }
  0xf4   :  { %v752_v52 = vpop.f32.mrf.mxu1 }
  0xf5   :  { %v332_v53 = vadd.f32 %v718_v50, %v682_v51  ;;  %v753_v54 = vadd.f32 %v752_v52, %v751_v48 }
  0xf7   :  { %v402_v60 = vadd.f32 %v753_v54, %v332_v53 }
 0x112   :  { %v786_v56 = vpop.f32.mrf.mxu0 }
 0x113   :  { %v821_v57 = vpop.f32.mrf.mxu1 }
 0x114   :  { %v787_v58 = vpop.f32.mrf.mxu0 }
 0x115   :  { %v822_v59 = vpop.f32.mrf.mxu1  ;;  %v788_v61 = vadd.f32 %v787_v58, %v786_v56 }
 0x116   :  { %v823_v63 = vadd.f32 %v822_v59, %v821_v57 }
 0x117   :  { %v472_v62 = vadd.f32 %v788_v61, %v402_v60 }
 0x119   :  { %v542_v0 = vadd.f32 %v823_v63, %v472_v62 }
 0x11b   :  { %v545_v1 = vmax.f32 %v542_v0, 0.0 }
 0x11d   :  { %874 = vmatmul.mubr.f32.vlgmr.msra.gmra.mxu0 %v545_v1 }
 0x1dd   :  { %v635_v3 = vpop.f32.mrf.mxu0 }
 0x1de   :  { %v636_v4 = vadd.f32 %v683_v2, %v635_v3 }
 0x1df   :  { %v875_v5 = vpop.f32.mrf.mxu0 }
 0x1e0   :  { %639 = vst [vmem:[#allocation4] sm:$0xff] %v636_v4 }
 0x1e7   :  { %v658_v6 = vld [vmem:[#allocation4] sm:$0x3] }
 0x1e8   :  { %659 = vst [vmem:[%s1051_s5] sm:$0x3] %v658_v6 }
 0x1e9   :  { %677 = vsyncpa [#allocation3], 1 }

</bundles_post_ra>
